<compile_context>
chip_gen: v5e
topology: v5e:2x2
jax: 0.10.0
libtpu: 0.0.40
codegen_flags: <defaults>
</compile_context>

<pallas_src>
import functools

import jax
import jax.numpy as jnp
from jax.experimental import pallas as pl
from jax.experimental.pallas import tpu as pltpu


def _ce_multi_kernel(logits_ref, targets_ref, out_ref, *,
                     n_rows, tile, class_axis, need_mask):
    """Partial sum over this tile of -log_softmax(row)[target].

    Layouts:
      class_axis == 1: logits_ref [T, L], targets_ref [T, 1]  (rows on sublanes)
      class_axis == 0: logits_ref [L, T], targets_ref [1, T]  (rows on lanes)
    """
    pid = pl.program_id(0)
    row_axis = 1 - class_axis

    x = logits_ref[...].astype(jnp.float32)        # native dtype on the wire,
    t = targets_ref[...]                           # upcast in-vreg

    # Numerically stable:  loss = log(sum(exp(x - m))) - (picked - m)
    # (the +m cancels, so xm is reused by both the exp and the select).
    m = jnp.max(x, axis=class_axis, keepdims=True)
    xm = x - m
    s = jnp.sum(jnp.exp(xm), axis=class_axis, keepdims=True)

    # One-hot select of the target logit (no dynamic gather in VMEM).
    # NOTE: out-of-range targets silently contribute picked = 0 (loss = lse),
    # unlike torch.nn.CrossEntropyLoss which raises.
    cls = jax.lax.broadcasted_iota(jnp.int32, x.shape, class_axis)
    picked_m = jnp.sum(jnp.where(cls == t, xm, 0.0),
                       axis=class_axis, keepdims=True)

    losses = jnp.log(s) - picked_m                 # [T, 1] or [1, T]

    if need_mask:
        # Only the ragged last block has rows >= n_rows; their VMEM contents
        # are uninitialised (possibly NaN/Inf), so select them out of the sum.
        ridx = pid * tile + jax.lax.broadcasted_iota(jnp.int32, losses.shape,
                                                     row_axis)
        losses = jnp.where(ridx < n_rows, losses, 0.0)

    tile_sum = jnp.sum(losses)

    # Lane-dense (1, 1, 128) output block: sum at lane 0, zeros elsewhere
    # (unmasked vst; the wrapper sums the whole partial array).
    lane = jax.lax.broadcasted_iota(jnp.int32, out_ref.shape, 2)
    out_ref[...] = jnp.where(lane == 0, tile_sum, 0.0)


def _vmem_capacity_bytes():
    """Physical VMEM of the attached TPU; conservative fallback = v7x (64 MiB)."""
    try:
        cap = getattr(pltpu.get_tpu_info(), "vmem_capacity_bytes", None)
        if cap:
            return int(cap)
    except Exception:
        pass
    return 64 * 1024 * 1024


def _pick_tile(n_rows, n_classes, itemsize, transposed, vmem_budget_bytes):
    """Rows per grid step.

    Budgets the double-buffered native-dtype logits block PLUS ~4 live f32
    [T, L] in-kernel temporaries (f32 upcast, x-m, exp/select result, i32
    iota) plus targets / per-row temps; targets ~2 MiB of logits per step;
    keeps n_tiles >= 2 when possible so the "parallel" axis can feed 2 cores.
    """
    g = 128 if transposed else 8                     # row-axis HW granularity
    block_row = n_classes * itemsize                 # native logits bytes/row
    temp_row = 4 * n_classes * 4                     # f32 temps + i32 iota/row
    extra_row = 24 if transposed else 3 * 1024       # targets + lane-padded [T,1] temps
    per_row = 2 * block_row + temp_row + extra_row

    rows_by_vmem = max(g, vmem_budget_bytes // per_row)
    rows_by_dma = pl.cdiv(2 * 1024 * 1024, max(1, block_row))   # ~2 MiB / step
    tile = min(rows_by_vmem, max(g, rows_by_dma))
    if n_rows > 2 * g:                               # leave >= 2 blocks for 2 TCs (v7x)
        tile = min(tile, pl.cdiv(n_rows, 2))
    if tile >= n_rows:
        return int(n_rows)                           # single full-extent block
    return int(max(g, (tile // g) * g))


def ce_loss_multi(logits, targets, class_labels_num):
    """JAX/Pallas equivalent of CELossMulti.forward.

    Args:
      logits:  [B, K * class_labels_num] float array (any float dtype).
      targets: [B, K] integer array of class indices in [0, class_labels_num).
               NOTE: out-of-range indices do NOT raise (they yield loss = lse),
               unlike torch.nn.CrossEntropyLoss.
      class_labels_num: L, number of classes per chunk.

    Returns:
      scalar float32 loss.
    """
    B, C_total = logits.shape
    L = int(class_labels_num)
    assert C_total % L == 0, "logits width must be a multiple of class_labels_num"
    K = C_total // L
    assert targets.shape == (B, K)

    n_rows = B * K
    x = logits.reshape(n_rows, L)                    # pure view, no copy
    t = targets.reshape(n_rows).astype(jnp.int32)

    transposed = L < 128
    if transposed:
        # Small-L path: rows on the 128-wide lane axis, classes on sublanes.
        # Costs one XLA transpose of the logits but removes the ~128/L
        # lane-sparsity of the in-kernel vector work.
        x = x.T                                      # [L, N]
        t = t.reshape(1, n_rows)                     # lane-dense targets
    else:
        # TODO(synk): for vocab-scale L add an inner L-tile grid axis
        # ("arbitrary") with online logsumexp + online picked accumulation so
        # row tiles stay large within v7x's 64 MiB VMEM.
        t = t.reshape(n_rows, 1)

    cap = _vmem_capacity_bytes()
    tile = _pick_tile(n_rows, L, x.dtype.itemsize, transposed,
                      vmem_budget_bytes=int(cap * 0.6))
    n_tiles = pl.cdiv(n_rows, tile)
    need_mask = (n_rows % tile) != 0                 # only the ragged last block

    if transposed:
        x_spec = pl.BlockSpec((L, tile), lambda i: (0, i))
        t_spec = pl.BlockSpec((1, tile), lambda i: (0, i))
        class_axis = 0
    else:
        x_spec = pl.BlockSpec((tile, L), lambda i: (i, 0))
        t_spec = pl.BlockSpec((tile, 1), lambda i: (i, 0))
        class_axis = 1

    kernel = functools.partial(_ce_multi_kernel, n_rows=n_rows, tile=tile,
                               class_axis=class_axis, need_mask=need_mask)

    cost = pl.CostEstimate(
        flops=6 * n_rows * L,
        transcendentals=n_rows * L,
        bytes_accessed=(n_rows * L * x.dtype.itemsize + n_rows * 4
                        + n_tiles * 128 * 4),
    )

    partial_sums = pl.pallas_call(
        kernel,
        out_shape=jax.ShapeDtypeStruct((n_tiles, 1, 128), jnp.float32),
        grid=(n_tiles,),
        in_specs=[x_spec, t_spec],
        out_specs=pl.BlockSpec((1, 1, 128), lambda i: (i, 0, 0)),
        compiler_params=pltpu.CompilerParams(
            dimension_semantics=("parallel",),
            vmem_limit_bytes=int(cap * 0.75),
        ),
        cost_estimate=cost,
    )(x, t)

    return jnp.sum(partial_sums) * (1.0 / n_rows)


def _ce_loss_multi_ref(logits, targets, class_labels_num):
    """Pure-JAX reference matching the PyTorch module."""
    B, C_total = logits.shape
    L = class_labels_num
    K = C_total // L
    x = logits.reshape(B, K, L).astype(jnp.float32)
    logp = jax.nn.log_softmax(x, axis=-1)                      # [B, K, L]
    picked = jnp.take_along_axis(logp, targets[..., None].astype(jnp.int32),
                                 axis=-1)[..., 0]              # [B, K]
    return jnp.mean(-picked)                                   # == (1/K) sum_c mean_b CE


if __name__ == "__main__":
    key = jax.random.PRNGKey(0)

    # Case 1: module-scale config (batch=2, K=4 label groups, L=8)
    #         -> small-L transposed path, single full-extent block.
    # Case 2: small-L transposed path, multiple tiles + ragged last block.
    # Case 3: L >= 128 row-major path, bf16 logits, multiple tiles + ragged.
    cases = [
        (2, 4, 8, jnp.float32),
        (37, 9, 5, jnp.float32),
        (10, 2, 200, jnp.bfloat16),
    ]
    for idx, (B, K, L, dt) in enumerate(cases):
        k1, k2, key = jax.random.split(key, 3)
        logits = jax.random.normal(k1, (B, K * L), dtype=jnp.float32).astype(dt)
        targets = jax.random.randint(k2, (B, K), 0, L, dtype=jnp.int32)

        loss = jax.block_until_ready(ce_loss_multi(logits, targets, L))
        ref = _ce_loss_multi_ref(logits, targets, L)
        assert jnp.allclose(loss, ref, atol=2e-5, rtol=2e-5), (idx, loss, ref)

    print("KERNEL_OK")
</pallas_src>

<mosaic_0001>
module attributes {stable_mosaic.version = 11 : i64} {
  func.func @_ce_multi_kernel(%arg0: i32, %arg1: memref<8x8xf32, #tpu.memory_space<vmem>>, %arg2: memref<1x8xi32, #tpu.memory_space<vmem>>, %arg3: memref<1x1x128xf32, #tpu.memory_space<vmem>>) attributes {dimension_semantics = [#tpu.dimension_semantics<parallel>], iteration_bounds = array<i64: 1>, scalar_prefetch = 0 : i64, scratch_operands = 0 : i64, tpu.core_type = #tpu.core_type<tc>, window_params = [{transform_indices = @transform_0, window_bounds = array<i64: 8, 8>}, {transform_indices = @transform_1, window_bounds = array<i64: 1, 8>}, {transform_indices = @transform_2, window_bounds = array<i64: 1, 1, 128>}]} {
    %c0 = arith.constant 0 : index
    %c0_0 = arith.constant 0 : index
    %0 = vector.load %arg1[%c0, %c0_0] : memref<8x8xf32, #tpu.memory_space<vmem>>, vector<8x8xf32>
    %c0_1 = arith.constant 0 : index
    %c0_2 = arith.constant 0 : index
    %1 = vector.load %arg2[%c0_1, %c0_2] : memref<1x8xi32, #tpu.memory_space<vmem>>, vector<1x8xi32>
    %cst = arith.constant dense<0xFF800000> : vector<8xf32>
    %2 = vector.multi_reduction <maximumf>, %0, %cst [0] : vector<8x8xf32> to vector<8xf32>
    %3 = vector.shape_cast %2 : vector<8xf32> to vector<1x8xf32>
    %4 = vector.broadcast %3 : vector<1x8xf32> to vector<8x8xf32>
    %5 = arith.subf %0, %4 : vector<8x8xf32>
    %6 = math.exp %5 : vector<8x8xf32>
    %cst_3 = arith.constant dense<0.000000e+00> : vector<8xf32>
    %7 = vector.multi_reduction <add>, %6, %cst_3 [0] : vector<8x8xf32> to vector<8xf32>
    %8 = vector.shape_cast %7 : vector<8xf32> to vector<1x8xf32>
    %9 = tpu.iota {dimensions = array<i32: 0>} : vector<8x8xi32>
    %10 = vector.broadcast %1 : vector<1x8xi32> to vector<8x8xi32>
    %11 = arith.cmpi eq, %9, %10 : vector<8x8xi32>
    %cst_4 = arith.constant 0.000000e+00 : f32
    %12 = vector.broadcast %cst_4 : f32 to vector<8x8xf32>
    %13 = arith.select %11, %5, %12 : vector<8x8xi1>, vector<8x8xf32>
    %cst_5 = arith.constant dense<0.000000e+00> : vector<8xf32>
    %14 = vector.multi_reduction <add>, %13, %cst_5 [0] : vector<8x8xf32> to vector<8xf32>
    %15 = vector.shape_cast %14 : vector<8xf32> to vector<1x8xf32>
    %16 = math.log %8 : vector<1x8xf32>
    %17 = arith.subf %16, %15 : vector<1x8xf32>
    %18 = vector.shape_cast %17 : vector<1x8xf32> to vector<1x1x8xf32>
    %cst_6 = arith.constant dense<0.000000e+00> : vector<1xf32>
    %19 = vector.multi_reduction <add>, %18, %cst_6 [1, 2] : vector<1x1x8xf32> to vector<1xf32>
    %20 = vector.shape_cast %19 : vector<1xf32> to vector<1x1x1xf32>
    %21 = vector.extract %20[0, 0, 0] : f32 from vector<1x1x1xf32>
    %22 = tpu.iota {dimensions = array<i32: 2>} : vector<1x1x128xi32>
    %c0_i32 = arith.constant 0 : i32
    %23 = vector.broadcast %c0_i32 : i32 to vector<1x1x128xi32>
    %24 = arith.cmpi eq, %22, %23 : vector<1x1x128xi32>
    %cst_7 = arith.constant 0.000000e+00 : f32
    %25 = vector.broadcast %21 : f32 to vector<1x1x128xf32>
    %26 = vector.broadcast %cst_7 : f32 to vector<1x1x128xf32>
    %27 = arith.select %24, %25, %26 : vector<1x1x128xi1>, vector<1x1x128xf32>
    %c0_8 = arith.constant 0 : index
    %c0_9 = arith.constant 0 : index
    %c0_10 = arith.constant 0 : index
    %28 = vector.load %arg3[%c0_8, %c0_9, %c0_10] : memref<1x1x128xf32, #tpu.memory_space<vmem>>, vector<1x1x128xf32>
    tpu.vector_store %arg3[%c0_8, %c0_9, %c0_10], %27 {strides = array<i32>} : memref<1x1x128xf32, #tpu.memory_space<vmem>>, vector<1x1x128xf32>,
    return
  }
  func.func @transform_0(%arg0: i32) -> (i32, i32) {
    %c0_i32 = arith.constant 0 : i32
    %c0_i32_0 = arith.constant 0 : i32
    return %c0_i32, %arg0 : i32, i32
  }
  func.func @transform_1(%arg0: i32) -> (i32, i32) {
    %c0_i32 = arith.constant 0 : i32
    %c0_i32_0 = arith.constant 0 : i32
    return %c0_i32, %arg0 : i32, i32
  }
  func.func @transform_2(%arg0: i32) -> (i32, i32, i32) {
    %c0_i32 = arith.constant 0 : i32
    %c0_i32_0 = arith.constant 0 : i32
    %c0_i32_1 = arith.constant 0 : i32
    return %arg0, %c0_i32, %c0_i32_0 : i32, i32, i32
  }
}

</mosaic_0001>

<bundles_post_ra>
// kernel: tpu_custom_call.1
= control target key start
LH: loop header
LB: loop body
LE: loop exit
PB: predicated region body
PF: predicated region fallthrough
CT: control target
= control target key end

     0   :  { %7 = vsyncpa [#allocation3], 0  ;;  %s228_s0 = inlined_call_operand.hbm [shape: f32[8,8], index: 0, kind: input, shape index: {}]   ;;  %s229_s1 = inlined_call_operand.hbm [shape: s32[1,8], index: 1, kind: input, shape index: {}]   ;;  %s230_s2 = inlined_call_operand.hbm [shape: f32[1,1,128], index: 2, kind: output, shape index: {}]  }
   0x1   :  { %8 = vsyncpa [#allocation6], 0 }
   0x2   :  { %9 = vsyncpa [#allocation4], 0  ;;  %s15_s11 = sshll.u32 %s228_s0, 4  ;;  %s198_s12 = smov [#allocation2]   ;;  %s16_s11 = int_to_ptr.hbm [resolvable:$true] %s15_s11 }
   0x3   :  { %s17_s13 = sshll.u32 %s198_s12, 4  ;;  %s26_s16 = sshll.u32 %s229_s1, 4  ;;  %s18_s13 = int_to_ptr.vmem [resolvable:$true] %s17_s13  ;;  %s27_s16 = int_to_ptr.hbm [resolvable:$true] %s26_s16 }
   0x4   :  { %20 = dma.hbm_to_vmem [thread:$0]  %s16_s11, 128, %s18_s13, [#allocation3]  }
   0x5   :  { %s199_s17 = smov [#allocation5]  }
   0x6   :  { %s28_s18 = sshll.u32 %s199_s17, 4  ;;  %s29_s18 = int_to_ptr.vmem [resolvable:$true] %s28_s18 }
   0x7   :  { %31 = dma.hbm_to_vmem [thread:$0]  %s27_s16, 16, %s29_s18, [#allocation6]  }
   0x8   :  { %192 = dma.done.wait [#allocation3], 128  }
   0x9   :  { %193 = vsyncadd [#allocation3], 4294967168 }
   0xa   :  { %194 = dma.done.wait [#allocation6], 16  }
   0xb   :  { %195 = vsyncadd [#allocation6], 4294967280  ;;  %vm42_vm0 = vcmask 64512   ;;  %v40_v0 = vld [vmem:[#allocation2] sm:$0xff]  ;;  %v60_v5 = vlaneseq  ;;  %v115_v9 = vld [vmem:[#allocation5] ss:$0 sm:$0xff] }
   0xc   :  { %v43_v1 = vsel %vm42_vm0, %v40_v0, -inf  ;;  %vm75_vm2 = vcmask 57344   ;;  %s200_s0 = smov [#allocation7]   ;;  %s99_s21 = sshll.u32 %s230_s2, 4  ;;  %s100_s21 = int_to_ptr.hbm [resolvable:$true] %s99_s21 }
   0xd   :  { %v44_v2 = vrot.slane %v43_v1, 4  ;;  %v61_v8 = vshrl.u32 %v60_v5, 7  ;;  %v87_v40 = vand.u32 127, %v60_v5  ;;  %s97_s1 = sshll.u32 %s200_s0, 4  ;;  %s98_s1 = int_to_ptr.vmem [resolvable:$true] %s97_s1 }
   0xf   :  { %v45_v3 = vmax.f32 %v43_v1, %v44_v2  ;;  %vm63_vm1 = vcmp.eq.s32.totalorder %v61_v8, %v115_v9  ;;  %vm88_vm3 = vcmp.eq.s32.totalorder %v87_v40, 0 }
  0x11   :  { %v46_v4 = vrot.slane %v45_v3, 2 }
  0x13   :  { %v47_v6 = vmax.f32 %v45_v3, %v46_v4 }
  0x15   :  { %v48_v7 = vrot.slane %v47_v6, 1 }
  0x17   :  { %v49_v10 = vmax.f32 %v47_v6, %v48_v7 }
  0x19   :  { %v50_v11 = vsub.f32 %v40_v0, %v49_v10 }
  0x1b   :  { %v51_v12 = vmul.f32 1.442695, %v50_v11  ;;  %v64_v13 = vsel %vm63_vm1, %v50_v11, 0.0 }
  0x1c   :  { %v65_v14 = vsel %vm42_vm0, %v64_v13, 0.0 }
  0x1d   :  { %116 = vpow2.f32 %v51_v12  ;;  %v66_v15 = vrot.slane %v65_v14, 4 }
  0x1f   :  { %v67_v19 = vadd.f32 %v66_v15, %v65_v14 }
  0x21   :  { %v68_v22 = vrot.slane %v67_v19, 2 }
  0x23   :  { %v117_v16 = vpop.eup %116  ;;  %v69_v25 = vadd.f32 %v68_v22, %v67_v19 }
  0x24   :  { %v53_v17 = vsel %vm42_vm0, %v117_v16, 0.0 }
  0x25   :  { %v54_v18 = vrot.slane %v53_v17, 4  ;;  %v70_v27 = vrot.slane %v69_v25, 1 }
  0x27   :  { %v55_v20 = vadd.f32 %v54_v18, %v53_v17  ;;  %v71_v28 = vadd.f32 %v70_v27, %v69_v25 }
  0x29   :  { %v56_v21 = vrot.slane %v55_v20, 2 }
  0x2b   :  { %v57_v23 = vadd.f32 %v56_v21, %v55_v20 }
  0x2d   :  { %v58_v24 = vrot.slane %v57_v23, 1 }
  0x2f   :  { %v59_v26 = vadd.f32 %v58_v24, %v57_v23 }
  0x31   :  { %118 = vlog2.f32 %v59_v26 }
  0x37   :  { %v119_v29 = vpop.eup %118 }
  0x38   :  { %v73_v30 = vmul.f32 0.6931472, %v119_v29 }
  0x3a   :  { %v74_v31 = vsub.f32 %v73_v30, %v71_v28 }
  0x3c   :  { %v76_v32 = vsel %vm75_vm2, %v74_v31, 0.0 }
  0x3d   :  { %77 = vadd.xlane.f32.xlu0 %v76_v32 }
  0xb0   :  { %v78_v33 = vpop.xlane.xlu0 %77 }
  0xb1   :  { %v79_v34 = vrot.slane %v78_v33, 4 }
  0xb3   :  { %v80_v35 = vadd.f32 %v79_v34, %v78_v33 }
  0xb5   :  { %v81_v36 = vrot.slane %v80_v35, 2 }
  0xb7   :  { %v82_v37 = vadd.f32 %v81_v36, %v80_v35 }
  0xb9   :  { %v83_v38 = vrot.slane %v82_v37, 1 }
  0xbb   :  { %v84_v39 = vadd.f32 %v83_v38, %v82_v37 }
  0xbd   :  { %110 = vpush %v84_v39 }
  0xee   :  { %s111_s22 = spop %110 }
  0xef   :  { %v89_v41 = vstv %s111_s22 }
  0xf0   :  { %v90_v42 = vsel %vm88_vm3, %v89_v41, 0.0 }
  0xf1   :  { %91 = vst [vmem:[#allocation7] sm:$0x1] %v90_v42 }
  0xf2   :  { %102 = dma.vmem_to_hbm [thread:$0]  %s98_s1, 16, %s100_s21, [#allocation4]  }
  0xf3   :  { %196 = dma.done.wait [#allocation4], 16  }
  0xf4   :  { %197 = vsyncadd [#allocation4], 4294967280 }
  0xf5   :  { %107 = vsyncpa [#allocation3], 1 }
  0xf6   :  { %108 = vsyncpa [#allocation6], 1 }
  0xf7   :  { %109 = vsyncpa [#allocation4], 1 }

</bundles_post_ra>
